<compile_context>
chip_gen: v7x
topology: tpu7x:2x2x1
jax: 0.10.0
libtpu: 0.0.40
codegen_flags: <defaults>
</compile_context>

<pallas_src>
import functools

import jax
import jax.numpy as jnp
from jax.experimental import pallas as pl
from jax.experimental.pallas import tpu as pltpu


def _classifier_kernel(n_classes,
                       temp_ref,                      # SMEM (1,) f32
                       x_ref,                         # (TB, K)   compute dtype
                       w1_ref, b1_ref,                # (K, H) cd, (1, H) f32
                       w2_ref, b2_ref,                # (H, H) cd, (1, H) f32
                       wh_ref, bh_ref,                # (H, 2C) cd, (1, 2C) f32
                       logits_ref,                    # (TB, C) f32
                       unc_ref):                      # (TB, C) f32
    x = x_ref[...]

    # feature_extractor: Linear -> ReLU -> (Dropout: identity in eval) x2.
    # MXU matmuls with f32 accumulation; bias/ReLU in f32 (v5e-safe).
    h1 = jnp.dot(x, w1_ref[...], preferred_element_type=jnp.float32) + b1_ref[...]
    h1 = jnp.maximum(h1, 0.0)
    h2 = jnp.dot(h1.astype(w2_ref.dtype), w2_ref[...],
                 preferred_element_type=jnp.float32) + b2_ref[...]
    h2 = jnp.maximum(h2, 0.0)

    # Fused heads: [classifier | uncertainty] in one lane-contiguous matmul.
    head = jnp.dot(h2.astype(wh_ref.dtype), wh_ref[...],
                   preferred_element_type=jnp.float32) + bh_ref[...]

    # Hoisted temperature scale: one scalar reciprocal, then a multiply.
    inv_t = 1.0 / temp_ref[0]

    # Split the fused head in-kernel (no post-kernel HBM re-read of a packed output).
    logits_ref[...] = (head[:, :n_classes] * inv_t).astype(logits_ref.dtype)
    unc_ref[...] = jnp.exp(head[:, n_classes:]).astype(unc_ref.dtype)
    # TODO(synk): training-mode MC-dropout epistemic variance not implemented
    # (eval-mode forward -> epistemic uncertainty is exactly zero).


def _round_up(v, m):
    return -(-v // m) * m


def _padded_bytes(rows, cols, dtype):
    """Bytes of a VMEM tile with lane (128) / sublane padding for the dtype."""
    itemsize = jnp.dtype(dtype).itemsize
    sublane = 8 * max(1, 4 // itemsize)          # 8 for f32, 16 for bf16
    return _round_up(max(rows, 1), sublane) * _round_up(max(cols, 1), 128) * itemsize


def _vmem_capacity_bytes():
    try:
        cap = int(pltpu.get_tpu_info().vmem_capacity_bytes)
        if cap > 0:
            return cap
    except Exception:
        pass
    return 64 << 20  # conservative (v7x) fallback


def _num_tensorcores():
    """Best-effort TensorCore count per chip (1 on v5e/v6e, 2 on v7x)."""
    try:
        info = pltpu.get_tpu_info()
        for attr in ("num_cores", "core_count", "num_tensorcores",
                     "tensorcores_per_chip"):
            v = getattr(info, attr, None)
            if isinstance(v, int) and v > 0:
                return v
    except Exception:
        pass
    try:
        d = jax.devices()[0]
        for attr in ("num_cores", "core_count"):
            v = getattr(d, attr, None)
            if isinstance(v, int) and v > 0:
                return v
    except Exception:
        pass
    return 1


def uncertainty_aware_classifier(x, params, *, compute_dtype=jnp.bfloat16,
                                 batch_tile=2048):
    """Fused forward pass. x: (batch, input_dim).

    Returns (calibrated_logits, total_uncertainty), each (batch, n_classes) f32.
    """
    batch, input_dim = x.shape
    hidden = params["w1"].shape[1]
    n_classes = params["wc"].shape[1]
    head_dim = 2 * n_classes

    # Pack the two heads into one weight / bias (single MXU push per tile).
    wh = jnp.concatenate([params["wc"], params["wu"]], axis=1).astype(compute_dtype)
    bh = jnp.concatenate([params["bc"], params["bu"]], axis=1).astype(jnp.float32)

    # bf16 MXU inputs; biases stay f32 (added after f32 accumulation).
    xc = x.astype(compute_dtype)
    w1 = params["w1"].astype(compute_dtype)
    w2 = params["w2"].astype(compute_dtype)
    b1 = params["b1"].astype(jnp.float32)
    b2 = params["b2"].astype(jnp.float32)
    temp = params["temperature"].astype(jnp.float32)

    # Batch tile selection:
    #   * large batch: big 8-aligned tile (fewer grid steps amortise fixed cost)
    #   * small batch on a multi-TC chip (v7x): split so >=2 grid steps exist and
    #     the "parallel" axis populates both TensorCores.
    num_cores = _num_tensorcores()
    if batch > batch_tile:
        tb = batch_tile
    elif num_cores > 1 and batch >= 16:
        tb = min(batch_tile, _round_up(pl.cdiv(batch, num_cores), 8))
    else:
        tb = batch
    grid = (pl.cdiv(batch, tb),)

    # VMEM budget with lane/sublane padding.  Weights + pipelined blocks are
    # double-buffered by the Pallas pipeline; intermediates counted once.
    weight_bytes = (_padded_bytes(input_dim, hidden, compute_dtype)
                    + _padded_bytes(hidden, hidden, compute_dtype)
                    + _padded_bytes(hidden, head_dim, compute_dtype)
                    + 2 * _padded_bytes(1, hidden, jnp.float32)
                    + _padded_bytes(1, head_dim, jnp.float32))
    tile_bytes = (_padded_bytes(tb, input_dim, compute_dtype)
                  + 2 * _padded_bytes(tb, n_classes, jnp.float32))
    interm_bytes = (2 * _padded_bytes(tb, hidden, jnp.float32)
                    + _padded_bytes(tb, head_dim, jnp.float32))
    vmem_limit = 2 * weight_bytes + 2 * tile_bytes + interm_bytes + (4 << 20)
    vmem_limit = max(vmem_limit, 32 << 20)
    # Generation-aware ceiling: ~100 MiB on v5e/v6e (128 MiB phys), ~51 MiB on v7x.
    vmem_cap = min(100 << 20, int(0.8 * _vmem_capacity_bytes()))
    vmem_limit = int(min(vmem_limit, vmem_cap))

    in_specs = [
        pl.BlockSpec(memory_space=pltpu.SMEM),                   # temperature scalar
        pl.BlockSpec((tb, input_dim), lambda i: (i, 0)),         # x tile (pipelined)
        pl.BlockSpec((input_dim, hidden), lambda i: (0, 0)),     # w1 (VMEM-resident)
        pl.BlockSpec((1, hidden), lambda i: (0, 0)),             # b1
        pl.BlockSpec((hidden, hidden), lambda i: (0, 0)),        # w2
        pl.BlockSpec((1, hidden), lambda i: (0, 0)),             # b2
        pl.BlockSpec((hidden, head_dim), lambda i: (0, 0)),      # packed head weight
        pl.BlockSpec((1, head_dim), lambda i: (0, 0)),           # packed head bias
    ]
    out_specs = [
        pl.BlockSpec((tb, n_classes), lambda i: (i, 0)),         # calibrated logits
        pl.BlockSpec((tb, n_classes), lambda i: (i, 0)),         # aleatoric uncertainty
    ]
    out_shape = [
        jax.ShapeDtypeStruct((batch, n_classes), jnp.float32),
        jax.ShapeDtypeStruct((batch, n_classes), jnp.float32),
    ]

    logits, uncertainty = pl.pallas_call(
        functools.partial(_classifier_kernel, n_classes),
        out_shape=out_shape,
        grid=grid,
        in_specs=in_specs,
        out_specs=out_specs,
        compiler_params=pltpu.CompilerParams(
            dimension_semantics=("parallel",),
            vmem_limit_bytes=vmem_limit),
    )(temp, xc, w1, b1, w2, b2, wh, bh)

    return logits, uncertainty


def init_params(key, input_dim, hidden_dim, n_classes):
    """Deterministic synthetic parameter init (PyTorch-style uniform fan-in scale)."""
    ks = jax.random.split(key, 8)

    def linear(kw, kb, fan_in, fan_out):
        bound = 1.0 / jnp.sqrt(jnp.float32(fan_in))
        w = jax.random.uniform(kw, (fan_in, fan_out), jnp.float32, -bound, bound)
        b = jax.random.uniform(kb, (1, fan_out), jnp.float32, -bound, bound)
        return w, b

    w1, b1 = linear(ks[0], ks[1], input_dim, hidden_dim)
    w2, b2 = linear(ks[2], ks[3], hidden_dim, hidden_dim)
    wc, bc = linear(ks[4], ks[5], hidden_dim, n_classes)
    wu, bu = linear(ks[6], ks[7], hidden_dim, n_classes)

    return {
        "w1": w1, "b1": b1,
        "w2": w2, "b2": b2,
        "wc": wc, "bc": bc,
        "wu": wu, "bu": bu,
        "temperature": jnp.full((1,), 1.5, jnp.float32),  # != 1 to exercise calibration
    }


def reference_forward(x, params, compute_dtype=jnp.bfloat16):
    """Pure-JAX reference mirroring the kernel's bf16-in / f32-accumulate math."""
    cd = compute_dtype
    w1 = params["w1"].astype(cd)
    w2 = params["w2"].astype(cd)
    wc = params["wc"].astype(cd)
    wu = params["wu"].astype(cd)
    h1 = jnp.maximum(
        jnp.dot(x.astype(cd), w1, preferred_element_type=jnp.float32) + params["b1"], 0.0)
    h2 = jnp.maximum(
        jnp.dot(h1.astype(cd), w2, preferred_element_type=jnp.float32) + params["b2"], 0.0)
    logits = jnp.dot(h2.astype(cd), wc, preferred_element_type=jnp.float32) + params["bc"]
    log_var = jnp.dot(h2.astype(cd), wu, preferred_element_type=jnp.float32) + params["bu"]
    return logits / params["temperature"][0], jnp.exp(log_var)


if __name__ == "__main__":
    key = jax.random.PRNGKey(0)
    k_x, k_p, k_x2 = jax.random.split(key, 3)

    batch, input_dim, hidden_dim, n_classes = 8, 32, 128, 4

    x = jax.random.normal(k_x, (batch, input_dim), jnp.float32)
    params = init_params(k_p, input_dim, hidden_dim, n_classes)

    logits, uncertainty = uncertainty_aware_classifier(x, params)
    jax.block_until_ready((logits, uncertainty))

    ref_logits, ref_unc = reference_forward(x, params)
    assert logits.shape == (batch, n_classes)
    assert uncertainty.shape == (batch, n_classes)
    assert jnp.allclose(logits, ref_logits, atol=1e-2, rtol=1e-2)
    assert jnp.allclose(uncertainty, ref_unc, atol=1e-2, rtol=1e-2)

    # Exercise the multi-tile batch grid (including a partial last tile).
    batch2 = 300
    x2 = jax.random.normal(k_x2, (batch2, input_dim), jnp.float32)
    logits2, unc2 = uncertainty_aware_classifier(x2, params, batch_tile=128)
    jax.block_until_ready((logits2, unc2))
    ref_logits2, ref_unc2 = reference_forward(x2, params)
    assert logits2.shape == (batch2, n_classes)
    assert unc2.shape == (batch2, n_classes)
    assert jnp.allclose(logits2, ref_logits2, atol=1e-2, rtol=1e-2)
    assert jnp.allclose(unc2, ref_unc2, atol=1e-2, rtol=1e-2)

    print("KERNEL_OK")
</pallas_src>

<mosaic_0001>
module attributes {stable_mosaic.version = 11 : i64} {
  func.func @_classifier_kernel(%arg0: i32, %arg1: memref<1xf32, #tpu.memory_space<smem>>, %arg2: memref<8x32xbf16, #tpu.memory_space<vmem>>, %arg3: memref<32x128xbf16, #tpu.memory_space<vmem>>, %arg4: memref<1x128xf32, #tpu.memory_space<vmem>>, %arg5: memref<128x128xbf16, #tpu.memory_space<vmem>>, %arg6: memref<1x128xf32, #tpu.memory_space<vmem>>, %arg7: memref<128x8xbf16, #tpu.memory_space<vmem>>, %arg8: memref<1x8xf32, #tpu.memory_space<vmem>>, %arg9: memref<8x4xf32, #tpu.memory_space<vmem>>, %arg10: memref<8x4xf32, #tpu.memory_space<vmem>>) attributes {dimension_semantics = [#tpu.dimension_semantics<parallel>], iteration_bounds = array<i64: 1>, scalar_prefetch = 0 : i64, scratch_operands = 0 : i64, tpu.core_type = #tpu.core_type<tc>, window_params = [{transform_indices = @transform_0, window_bounds = array<i64: 1>}, {transform_indices = @transform_1, window_bounds = array<i64: 8, 32>}, {pipeline_mode = #tpu.pipeline_mode<synchronous>, transform_indices = @transform_2, window_bounds = array<i64: 32, 128>}, {pipeline_mode = #tpu.pipeline_mode<synchronous>, transform_indices = @transform_3, window_bounds = array<i64: 1, 128>}, {pipeline_mode = #tpu.pipeline_mode<synchronous>, transform_indices = @transform_4, window_bounds = array<i64: 128, 128>}, {pipeline_mode = #tpu.pipeline_mode<synchronous>, transform_indices = @transform_5, window_bounds = array<i64: 1, 128>}, {pipeline_mode = #tpu.pipeline_mode<synchronous>, transform_indices = @transform_6, window_bounds = array<i64: 128, 8>}, {pipeline_mode = #tpu.pipeline_mode<synchronous>, transform_indices = @transform_7, window_bounds = array<i64: 1, 8>}, {transform_indices = @transform_8, window_bounds = array<i64: 8, 4>}, {transform_indices = @transform_9, window_bounds = array<i64: 8, 4>}]} {
    %c0 = arith.constant 0 : index
    %c0_0 = arith.constant 0 : index
    %0 = vector.load %arg2[%c0, %c0_0] : memref<8x32xbf16, #tpu.memory_space<vmem>>, vector<8x32xbf16>
    %c0_1 = arith.constant 0 : index
    %c0_2 = arith.constant 0 : index
    %1 = vector.load %arg3[%c0_1, %c0_2] : memref<32x128xbf16, #tpu.memory_space<vmem>>, vector<32x128xbf16>
    %cst = arith.constant dense<0.000000e+00> : vector<8x128xf32>
    %2 = tpu.matmul %0, %1, %cst {dimension_numbers = #tpu.dot_dimension_numbers<[1], [0], [0], [1], [0, 0, 1, 1], [], []>} : vector<8x32xbf16>, vector<32x128xbf16>, vector<8x128xf32> -> vector<8x128xf32>
    %c0_3 = arith.constant 0 : index
    %c0_4 = arith.constant 0 : index
    %3 = vector.load %arg4[%c0_3, %c0_4] : memref<1x128xf32, #tpu.memory_space<vmem>>, vector<1x128xf32>
    %4 = vector.broadcast %3 : vector<1x128xf32> to vector<8x128xf32>
    %5 = arith.addf %2, %4 : vector<8x128xf32>
    %cst_5 = arith.constant 0.000000e+00 : f32
    %6 = vector.broadcast %cst_5 : f32 to vector<8x128xf32>
    %7 = arith.maximumf %5, %6 : vector<8x128xf32>
    %8 = arith.truncf %7 : vector<8x128xf32> to vector<8x128xbf16>
    %c0_6 = arith.constant 0 : index
    %c0_7 = arith.constant 0 : index
    %9 = vector.load %arg5[%c0_6, %c0_7] : memref<128x128xbf16, #tpu.memory_space<vmem>>, vector<128x128xbf16>
    %cst_8 = arith.constant dense<0.000000e+00> : vector<8x128xf32>
    %10 = tpu.matmul %8, %9, %cst_8 {dimension_numbers = #tpu.dot_dimension_numbers<[1], [0], [0], [1], [0, 0, 1, 1], [], []>} : vector<8x128xbf16>, vector<128x128xbf16>, vector<8x128xf32> -> vector<8x128xf32>
    %c0_9 = arith.constant 0 : index
    %c0_10 = arith.constant 0 : index
    %11 = vector.load %arg6[%c0_9, %c0_10] : memref<1x128xf32, #tpu.memory_space<vmem>>, vector<1x128xf32>
    %12 = vector.broadcast %11 : vector<1x128xf32> to vector<8x128xf32>
    %13 = arith.addf %10, %12 : vector<8x128xf32>
    %cst_11 = arith.constant 0.000000e+00 : f32
    %14 = vector.broadcast %cst_11 : f32 to vector<8x128xf32>
    %15 = arith.maximumf %13, %14 : vector<8x128xf32>
    %16 = arith.truncf %15 : vector<8x128xf32> to vector<8x128xbf16>
    %c0_12 = arith.constant 0 : index
    %c0_13 = arith.constant 0 : index
    %17 = vector.load %arg7[%c0_12, %c0_13] : memref<128x8xbf16, #tpu.memory_space<vmem>>, vector<128x8xbf16>
    %cst_14 = arith.constant dense<0.000000e+00> : vector<8x8xf32>
    %18 = tpu.matmul %16, %17, %cst_14 {dimension_numbers = #tpu.dot_dimension_numbers<[1], [0], [0], [1], [0, 0, 1, 1], [], []>} : vector<8x128xbf16>, vector<128x8xbf16>, vector<8x8xf32> -> vector<8x8xf32>
    %c0_15 = arith.constant 0 : index
    %c0_16 = arith.constant 0 : index
    %19 = vector.load %arg8[%c0_15, %c0_16] : memref<1x8xf32, #tpu.memory_space<vmem>>, vector<1x8xf32>
    %20 = vector.broadcast %19 : vector<1x8xf32> to vector<8x8xf32>
    %21 = arith.addf %18, %20 : vector<8x8xf32>
    %c0_17 = arith.constant 0 : index
    %22 = memref.load %arg1[%c0_17] : memref<1xf32, #tpu.memory_space<smem>>
    %cst_18 = arith.constant 1.000000e+00 : f32
    %23 = arith.divf %cst_18, %22 : f32
    %24 = vector.extract_strided_slice %21 {offsets = [0, 0], sizes = [8, 4], strides = [1, 1]} : vector<8x8xf32> to vector<8x4xf32>
    %25 = vector.broadcast %23 : f32 to vector<8x4xf32>
    %26 = arith.mulf %24, %25 : vector<8x4xf32>
    %c0_19 = arith.constant 0 : index
    %c0_20 = arith.constant 0 : index
    %27 = vector.load %arg9[%c0_19, %c0_20] : memref<8x4xf32, #tpu.memory_space<vmem>>, vector<8x4xf32>
    tpu.vector_store %arg9[%c0_19, %c0_20], %26 {strides = array<i32>} : memref<8x4xf32, #tpu.memory_space<vmem>>, vector<8x4xf32>,
    %28 = vector.extract_strided_slice %21 {offsets = [0, 4], sizes = [8, 4], strides = [1, 1]} : vector<8x8xf32> to vector<8x4xf32>
    %29 = math.exp %28 : vector<8x4xf32>
    %c0_21 = arith.constant 0 : index
    %c0_22 = arith.constant 0 : index
    %30 = vector.load %arg10[%c0_21, %c0_22] : memref<8x4xf32, #tpu.memory_space<vmem>>, vector<8x4xf32>
    tpu.vector_store %arg10[%c0_21, %c0_22], %29 {strides = array<i32>} : memref<8x4xf32, #tpu.memory_space<vmem>>, vector<8x4xf32>,
    return
  }
  func.func @transform_0(%arg0: i32) -> i32 {
    %c0_i32 = arith.constant 0 : i32
    %c0_i32_0 = arith.constant 0 : i32
    return %c0_i32 : i32
  }
  func.func @transform_1(%arg0: i32) -> (i32, i32) {
    %c0_i32 = arith.constant 0 : i32
    %c0_i32_0 = arith.constant 0 : i32
    return %arg0, %c0_i32 : i32, i32
  }
  func.func @transform_2(%arg0: i32) -> (i32, i32) {
    %c0_i32 = arith.constant 0 : i32
    %c0_i32_0 = arith.constant 0 : i32
    %c0_i32_1 = arith.constant 0 : i32
    return %c0_i32, %c0_i32_0 : i32, i32
  }
  func.func @transform_3(%arg0: i32) -> (i32, i32) {
    %c0_i32 = arith.constant 0 : i32
    %c0_i32_0 = arith.constant 0 : i32
    %c0_i32_1 = arith.constant 0 : i32
    return %c0_i32, %c0_i32_0 : i32, i32
  }
  func.func @transform_4(%arg0: i32) -> (i32, i32) {
    %c0_i32 = arith.constant 0 : i32
    %c0_i32_0 = arith.constant 0 : i32
    %c0_i32_1 = arith.constant 0 : i32
    return %c0_i32, %c0_i32_0 : i32, i32
  }
  func.func @transform_5(%arg0: i32) -> (i32, i32) {
    %c0_i32 = arith.constant 0 : i32
    %c0_i32_0 = arith.constant 0 : i32
    %c0_i32_1 = arith.constant 0 : i32
    return %c0_i32, %c0_i32_0 : i32, i32
  }
  func.func @transform_6(%arg0: i32) -> (i32, i32) {
    %c0_i32 = arith.constant 0 : i32
    %c0_i32_0 = arith.constant 0 : i32
    %c0_i32_1 = arith.constant 0 : i32
    return %c0_i32, %c0_i32_0 : i32, i32
  }
  func.func @transform_7(%arg0: i32) -> (i32, i32) {
    %c0_i32 = arith.constant 0 : i32
    %c0_i32_0 = arith.constant 0 : i32
    %c0_i32_1 = arith.constant 0 : i32
    return %c0_i32, %c0_i32_0 : i32, i32
  }
  func.func @transform_8(%arg0: i32) -> (i32, i32) {
    %c0_i32 = arith.constant 0 : i32
    %c0_i32_0 = arith.constant 0 : i32
    return %arg0, %c0_i32 : i32, i32
  }
  func.func @transform_9(%arg0: i32) -> (i32, i32) {
    %c0_i32 = arith.constant 0 : i32
    %c0_i32_0 = arith.constant 0 : i32
    return %arg0, %c0_i32 : i32, i32
  }
}

</mosaic_0001>

<bundles_post_ra>
// kernel: tpu_custom_call.1
= control target key start
LH: loop header
LB: loop body
LE: loop exit
PB: predicated region body
PF: predicated region fallthrough
CT: control target
= control target key end

     0   :  { %16 = vsyncpa [#allocation4], 0  ;;  %s506_s30 = smov [#allocation3]   ;;  %s668_s0 = inlined_call_operand.<no memory space> [shape: f32[1], index: 0, kind: input, shape index: {}]   ;;  %s669_s1 = inlined_call_operand.hbm [shape: bf16[8,32], index: 1, kind: input, shape index: {}]   ;;  %s670_s2 = inlined_call_operand.vmem [shape: bf16[32,128], index: 2, kind: input, shape index: {}]   ;;  %s671_s3 = inlined_call_operand.vmem [shape: f32[1,128], index: 3, kind: input, shape index: {}]   ;;  %s672_s4 = inlined_call_operand.vmem [shape: bf16[128,128], index: 4, kind: input, shape index: {}]   ;;  %s673_s5 = inlined_call_operand.vmem [shape: f32[1,128], index: 5, kind: input, shape index: {}]   ;;  %s674_s6 = inlined_call_operand.vmem [shape: bf16[128,8], index: 6, kind: input, shape index: {}]   ;;  %s675_s7 = inlined_call_operand.vmem [shape: f32[1,8], index: 7, kind: input, shape index: {}]   ;;  %s676_s8 = inlined_call_operand.vmem [shape: f32[8,4], index: 8, kind: output, shape index: {0}]   ;;  %s677_s9 = inlined_call_operand.vmem [shape: f32[8,4], index: 9, kind: output, shape index: {1}]  }
   0x1   :  { %s25_s10 = sshll.u32 %s506_s30, 4  ;;  %s482_s13 = scalar_lea.hbm %s669_s1, 64  ;;  %s26_s10 = int_to_ptr.vmem [resolvable:$true] %s25_s10 }
   0x2   :  { %p483_p0 = scmp.ne.s32.totalorder %s669_s1, %s482_s13  ;;  %p486_p1 = scmp.lt.u32.totalorder %s482_s13, %s669_s1 }
   0x4   :  { %p488_p2 = pnand %p486_p1, %p483_p0 }
   0x6   :  { %491 = shalt.err (!%p488_p2)
}
   0x7   :  { %s492_s18 = scalar_lea.vmem %s26_s10, 64  ;;  %p497_p4 = scmp.lt.s32.totalorder %s26_s10, %s26_s10 }
   0x8   :  { %p493_p3 = scmp.ne.s32.totalorder %s26_s10, %s492_s18  ;;  %p498_p5 = scmp.lt.s32.totalorder %s492_s18, %s492_s18 }
   0xa   :  { %p499_p6 = por %p498_p5, %p497_p4 }
   0xc   :  { %p500_p7 = pnand %p499_p6, %p493_p3 }
   0xe   :  { %503 = shalt.err (!%p500_p7)
}
   0xf   :  { %28 = dma.hbm_to_vmem [thread:$0]  %s669_s1, 64, %s26_s10, [#allocation4]  }
  0x10   :  { %504 = dma.done.wait [#allocation4], 64  }
  0x11   :  { %505 = vsyncadd [#allocation4], 4294967232  ;;  %v507_v0 = vmov 0.0   ;;  %vm508_vm0 = vmmov 0   ;;  %v460_v1 = vld [vmem:[%s670_s2] sm:$0xff]   ;;  %v461_v2 = vld [vmem:[%s670_s2 + $0x8] sm:$0xff]   ;;  %v340_v28 = vstv %s668_s0 }
  0x12   :  { %406 = vmatprep.subr.bf16.mxu0 %v507_v0  ;;  %410 = vmatprep.mubr.msk.bf16.mxu0 %vm508_vm0, %v507_v0  ;;  %v462_v3 = vld [vmem:[%s672_s4] sm:$0xff]   ;;  %vm69_vm1 = vcmask 261120   ;;  %v463_v4 = vld [vmem:[%s672_s4 + $0x8] sm:$0xff]   ;;  %v464_v6 = vld [vmem:[%s672_s4 + $0x10] sm:$0xff]   ;;  %478 = vrcp.f32 %v340_v28  ;;  %vm345_vm2 = vcmask 31744   ;;  %s509_s17 = smov 124  }
  0x13   :  { %414 = vmatprep.subr.bf16.mxu1 %v507_v0  ;;  %430 = vmatprep.mubr.msk.bf16.mxu1 %vm508_vm0, %v507_v0  ;;  %v45_v5 = vld [vmem:[#allocation3] sm:$0xf]  ;;  %v465_v7 = vld [vmem:[%s672_s4 + $0x18] sm:$0xff]   ;;  %v467_v9 = vld [vmem:[%s672_s4 + $0x28] sm:$0xff]  }
  0x14   :  { %407 = vmatpush3.bf16.msra.mxu0 %v460_v1  ;;  %415 = vmatpush3.bf16.msra.mxu1 %v462_v3  ;;  %v466_v8 = vld [vmem:[%s672_s4 + $0x20] sm:$0xff]   ;;  %v468_v10 = vld [vmem:[%s672_s4 + $0x30] sm:$0xff]   ;;  %v469_v11 = vld [vmem:[%s672_s4 + $0x38] sm:$0xff]  }
  0x15   :  { %408 = vmatprep.subr.bf16.mxu0 %v507_v0  ;;  %416 = vmatprep.subr.bf16.mxu1 %v507_v0  ;;  %v470_v12 = vld [vmem:[%s674_s6] sm:$0xff]   ;;  %v471_v13 = vld [vmem:[%s674_s6 + $0x8] sm:$0xff]   ;;  %v472_v14 = vld [vmem:[%s674_s6 + $0x10] sm:$0xff]  }
  0x16   :  { %v473_v15 = vld [vmem:[%s674_s6 + $0x18] sm:$0xff]   ;;  %v474_v16 = vld [vmem:[%s674_s6 + $0x20] sm:$0xff]   ;;  %v475_v17 = vld [vmem:[%s674_s6 + $0x28] sm:$0xff]  }
  0x17   :  { %v363_v18 = vld [vmem:[%s671_s3] ss:$0 sm:$0xff]  ;;  %v476_v26 = vld [vmem:[%s674_s6 + $0x30] sm:$0xff]   ;;  %v477_v27 = vld [vmem:[%s674_s6 + $0x38] sm:$0xff]  }
  0x18   :  { %409 = vmatpush3.bf16.msra.mxu0 %v461_v2  ;;  %417 = vmatpush3.bf16.msra.mxu1 %v463_v4  ;;  %v367_v30 = vld [vmem:[%s673_s5] ss:$0 sm:$0xff] }
  0x19   :  { %434 = vmatprep.subr.bf16.mxu0 %v507_v0  ;;  %418 = vmatprep.subr.bf16.mxu1 %v507_v0  ;;  %v376_v38 = vld [vmem:[%s675_s7] ss:$0 sm:$0xff] }
  0x1b   :  { %411 = vmatmul.mubr.msk.bf16.vlgmr.msra.gmra.mrb[0].mxu0 %vm69_vm1, %v45_v5 }
  0x1c   :  { %450 = vmatprep.mubr.msk.bf16.mxu0 %vm508_vm0, %v507_v0  ;;  %419 = vmatpush3.bf16.msra.mxu1 %v464_v6  ;;  %v479_v29 = vpop.eup %478 }
  0x1d   :  { %420 = vmatprep.subr.bf16.mxu1 %v507_v0  ;;  %435 = vmatpush3.bf16.msra.mxu0 %v470_v12  ;;  %454 = vpush %v479_v29 }
  0x1e   :  { %436 = vmatprep.subr.bf16.mxu0 %v507_v0 }
  0x20   :  { %421 = vmatpush3.bf16.msra.mxu1 %v465_v7 }
  0x21   :  { %422 = vmatprep.subr.bf16.mxu1 %v507_v0  ;;  %437 = vmatpush3.bf16.msra.mxu0 %v471_v13 }
  0x22   :  { %438 = vmatprep.subr.bf16.mxu0 %v507_v0 }
  0x24   :  { %423 = vmatpush3.bf16.msra.mxu1 %v466_v8 }
  0x25   :  { %424 = vmatprep.subr.bf16.mxu1 %v507_v0  ;;  %439 = vmatpush3.bf16.msra.mxu0 %v472_v14 }
  0x26   :  { %440 = vmatprep.subr.bf16.mxu0 %v507_v0 }
  0x28   :  { %425 = vmatpush3.bf16.msra.mxu1 %v467_v9 }
  0x29   :  { %426 = vmatprep.subr.bf16.mxu1 %v507_v0  ;;  %441 = vmatpush3.bf16.msra.mxu0 %v473_v15 }
  0x2a   :  { %442 = vmatprep.subr.bf16.mxu0 %v507_v0 }
  0x2c   :  { %427 = vmatpush3.bf16.msra.mxu1 %v468_v10 }
  0x2d   :  { %428 = vmatprep.subr.bf16.mxu1 %v507_v0  ;;  %443 = vmatpush3.bf16.msra.mxu0 %v474_v16 }
  0x2e   :  { %444 = vmatprep.subr.bf16.mxu0 %v507_v0 }
  0x30   :  { %429 = vmatpush3.bf16.msra.mxu1 %v469_v11 }
  0x31   :  { %445 = vmatpush3.bf16.msra.mxu0 %v475_v17 }
  0x32   :  { %446 = vmatprep.subr.bf16.mxu0 %v507_v0 }
  0x35   :  { %447 = vmatpush3.bf16.msra.mxu0 %v476_v26 }
  0x36   :  { %448 = vmatprep.subr.bf16.mxu0 %v507_v0 }
  0x39   :  { %449 = vmatpush3.bf16.msra.mxu0 %v477_v27 }
  0x4e   :  { %s455_s6 = spop %454 }
  0x4f   :  { %v343_v40 = vstv %s455_s6 }
  0xee   :  { %v107_v19 = vpop.f32.mrb[0].mxu0 }
  0xef   :  { %v108_v20 = vadd.f32 %v363_v18, %v107_v19  ;;  %v412_v21 = vpop.f32.mrb[1].mxu0 }
  0xf0   :  { %v110_v22 = vpop.f32.mrb[2].mxu0 }
  0xf1   :  { %v113_v23 = vmax.f32 %v108_v20, 0.0  ;;  %v413_v24 = vpop.f32.mrb[3].mxu0 }
  0xf3   :  { %v114_v25 = vpack.c.bf16 %v113_v23, %v113_v23 }
  0xf5   :  { %431 = vmatmul.mubr.bf16.vlgmr.msra.gmra.mrb[0].mxu1 %v114_v25 }
 0x1c8   :  { %v220_v31 = vpop.f32.mrb[0].mxu1 }
 0x1c9   :  { %v221_v32 = vadd.f32 %v367_v30, %v220_v31  ;;  %v432_v33 = vpop.f32.mrb[1].mxu1 }
 0x1ca   :  { %v223_v34 = vpop.f32.mrb[2].mxu1 }
 0x1cb   :  { %v226_v35 = vmax.f32 %v221_v32, 0.0  ;;  %v433_v36 = vpop.f32.mrb[3].mxu1 }
 0x1cd   :  { %v227_v37 = vpack.c.bf16 %v226_v35, %v226_v35 }
 0x1cf   :  { %451 = vmatmul.mubr.bf16.vlgmr.msra.gmra.mrb[4].mxu0 %v227_v37 }
 0x2a2   :  { %v333_v39 = vpop.f32.mrb[4].mxu0 }
 0x2a3   :  { %v334_v41 = vadd.f32 %v376_v38, %v333_v39  ;;  %v452_v42 = vpop.f32.mrb[5].mxu0 }
 0x2a4   :  { %v336_v43 = vpop.f32.mrb[6].mxu0 }
 0x2a5   :  { %v347_v44 = vmul.f32 1.442695, %v334_v41  ;;  %v344_v45 = vmul.f32 %v343_v40, %v334_v41  ;;  %v453_v46 = vpop.f32.mrb[7].mxu0 }
 0x2a7   :  { %480 = vpow2.f32 %v347_v44  ;;  %346 = vst.msk [vmem:[%s676_s8] sm:$0xff] %vm345_vm2, %v344_v45 }
 0x2b1   :  { %v481_v47 = vpop.eup %480 }
 0x2b2   :  { %350 = vrot.lane.b32.xlu0 %v481_v47, %s509_s17 }
 0x324   :  { %v351_v48 = vpop.permute.xlu0 %350 }
 0x325   :  { %353 = vst.msk [vmem:[%s677_s9] sm:$0xff] %vm345_vm2, %v351_v48 }
 0x326   :  { %362 = vsyncpa [#allocation4], 1 }

</bundles_post_ra>
